<compile_context>
chip_gen: v7x
topology: tpu7x:2x2x1
jax: 0.10.0
libtpu: 0.0.40
codegen_flags: <defaults>
</compile_context>

<pallas_src>
import functools

import jax
import jax.numpy as jnp
from jax.experimental import pallas as pl
from jax.experimental.pallas import tpu as pltpu


# ---------------------------------------------------------------------------
# Hardware helpers (static, queried outside the kernels)
# ---------------------------------------------------------------------------

def _round_up(x: int, m: int) -> int:
    return ((x + m - 1) // m) * m


def _device_kind() -> str:
    try:
        return jax.devices()[0].device_kind.lower()
    except Exception:
        return ""


def _num_tensorcores() -> int:
    # v7x is a megacore chip (2 TensorCores per chip); v5e/v6e expose one TC.
    return 2 if "v7" in _device_kind() else 1


def _vmem_capacity_bytes() -> int:
    try:
        return int(pltpu.get_tpu_info().vmem_capacity_bytes)
    except Exception:
        return (64 << 20) if "v7" in _device_kind() else (128 << 20)


def _pick_tile(total: int, candidates=(512, 256, 128)) -> int:
    """Largest candidate tile that divides `total` (total is a 128-multiple)."""
    for c in candidates:
        if c <= total and total % c == 0:
            return c
    return total


# ---------------------------------------------------------------------------
# Kernels
# ---------------------------------------------------------------------------

def _fused_mlp_kernel(x_ref, w1_ref, b1_ref, w2_ref, b2_ref, o_ref):
    """One (bb, F) x tile -> Linear -> ReLU -> Linear. Weights VMEM-resident."""
    # In-kernel cast to the MXU dtype (saves a wrapper pad/astype HBM pass).
    x = x_ref[...].astype(w1_ref.dtype)
    h = jnp.dot(x, w1_ref[...], preferred_element_type=jnp.float32)
    h = jnp.maximum(h + b1_ref[...], 0.0)
    out = jnp.dot(h.astype(w2_ref.dtype), w2_ref[...],
                  preferred_element_type=jnp.float32)
    o_ref[...] = (out + b2_ref[...]).astype(o_ref.dtype)


def _tiled_linear_kernel(x_ref, w_ref, b_ref, o_ref, acc_ref, *, relu):
    """K/N-tiled linear (+ optional ReLU) with f32 accumulator scratch."""
    k = pl.program_id(2)

    @pl.when(k == 0)
    def _():
        acc_ref[...] = jnp.zeros_like(acc_ref)

    acc_ref[...] += jnp.dot(x_ref[...].astype(w_ref.dtype), w_ref[...],
                            preferred_element_type=jnp.float32)

    @pl.when(k == pl.num_programs(2) - 1)
    def _():
        out = acc_ref[...] + b_ref[...]
        if relu:
            out = jnp.maximum(out, 0.0)
        o_ref[...] = out.astype(o_ref.dtype)


# ---------------------------------------------------------------------------
# pallas_call wrappers
# ---------------------------------------------------------------------------

@functools.partial(jax.jit, static_argnames=("bb", "out_dtype", "vmem_limit"))
def _fused_forward(x_p, w1_p, b1_p, w2_p, b2_p, *, bb, out_dtype, vmem_limit):
    B_pad, F = x_p.shape
    H_pad = w1_p.shape[1]
    grid = (B_pad // bb,)

    # Whole-array VMEM residents: one copy, no block pipelining of weights.
    # TODO(synk): on v7x with near-limit weights, place w1/w2 in
    # pltpu.MemorySpace.VMEM_SHARED so both TensorCores share one copy.
    resident = pl.BlockSpec(memory_space=pltpu.MemorySpace.VMEM)

    return pl.pallas_call(
        _fused_mlp_kernel,
        out_shape=jax.ShapeDtypeStruct((B_pad, H_pad), out_dtype),
        grid_spec=pltpu.PrefetchScalarGridSpec(
            num_scalar_prefetch=0,
            grid=grid,
            in_specs=[
                # x streams in its original dtype; full (unpadded) F last dim.
                pl.BlockSpec((bb, F), lambda i: (i, 0)),
                resident,   # w1 (F, H_pad) bf16
                resident,   # b1 (1, H_pad) f32
                resident,   # w2 (H_pad, H_pad) bf16
                resident,   # b2 (1, H_pad) f32
            ],
            out_specs=pl.BlockSpec((bb, H_pad), lambda i: (i, 0)),
        ),
        compiler_params=pltpu.CompilerParams(
            dimension_semantics=("parallel",),
            vmem_limit_bytes=vmem_limit,
        ),
    )(x_p, w1_p, b1_p, w2_p, b2_p)


def _tiled_linear(x, w, b, *, relu, out_dtype, tm, tn, tk, vmem_limit):
    M, K = x.shape
    _, N = w.shape
    grid = (M // tm, N // tn, K // tk)
    return pl.pallas_call(
        functools.partial(_tiled_linear_kernel, relu=relu),
        out_shape=jax.ShapeDtypeStruct((M, N), out_dtype),
        grid_spec=pltpu.PrefetchScalarGridSpec(
            num_scalar_prefetch=0,
            grid=grid,
            in_specs=[
                pl.BlockSpec((tm, tk), lambda i, j, k: (i, k)),
                pl.BlockSpec((tk, tn), lambda i, j, k: (k, j)),
                pl.BlockSpec((1, tn), lambda i, j, k: (0, j)),
            ],
            out_specs=pl.BlockSpec((tm, tn), lambda i, j, k: (i, j)),
            scratch_shapes=[pltpu.VMEM((tm, tn), jnp.float32)],
        ),
        compiler_params=pltpu.CompilerParams(
            dimension_semantics=("parallel", "parallel", "arbitrary"),
            vmem_limit_bytes=vmem_limit,
        ),
    )(x, w, b)


@functools.partial(jax.jit, static_argnames=("tm", "tn", "tk1", "tk2",
                                             "out_dtype", "vmem_limit"))
def _tiled_forward(x_p, w1_p, b1_p, w2_p, b2_p, *, tm, tn, tk1, tk2,
                   out_dtype, vmem_limit):
    # TODO(synk): the hidden activation round-trips HBM between the two
    # matmuls here; a single fused kernel streaming K/N weight tiles
    # (pltpu.emit_pipeline) would avoid that extra pass when the weights do
    # not fit VMEM.
    h = _tiled_linear(x_p, w1_p, b1_p, relu=True, out_dtype=jnp.bfloat16,
                      tm=tm, tn=tn, tk=tk1, vmem_limit=vmem_limit)
    return _tiled_linear(h, w2_p, b2_p, relu=False, out_dtype=out_dtype,
                         tm=tm, tn=tn, tk=tk2, vmem_limit=vmem_limit)


# ---------------------------------------------------------------------------
# Parameter preparation (call ONCE, reuse across forward calls)
# ---------------------------------------------------------------------------

def prepare_decoder_params(w1, b1, w2, b2, *, compute_dtype=jnp.bfloat16,
                           vmem_fraction=0.85, force_tiled=False):
    """Pad + cast the decoder weights once (hoisted out of the per-call path).

    w1: (in_features, hidden), b1: (hidden,)
    w2: (hidden, hidden),      b2: (hidden,)   — (in, out) layout for x @ W.
    """
    F, H = w1.shape
    H_pad = _round_up(H, 128)
    itm = jnp.dtype(compute_dtype).itemsize

    vmem_cap = int(_vmem_capacity_bytes() * vmem_fraction)
    resident_weight_bytes = (F * H_pad + H_pad * H_pad) * itm + 2 * H_pad * 4
    use_resident = (not force_tiled) and (
        resident_weight_bytes <= int(0.75 * vmem_cap))

    if use_resident:
        # Keep w1's K dim (=F) unpadded so x streams in its natural (bb, F)
        # shape with no wrapper-side pad/copy of x.
        w1_p = jnp.pad(w1, ((0, 0), (0, H_pad - H))).astype(compute_dtype)
    else:
        F_pad = _round_up(F, 128)
        w1_p = jnp.pad(w1, ((0, F_pad - F), (0, H_pad - H))).astype(compute_dtype)
    w2_p = jnp.pad(w2, ((0, H_pad - H), (0, H_pad - H))).astype(compute_dtype)
    b1_p = jnp.pad(b1, (0, H_pad - H)).astype(jnp.float32).reshape(1, H_pad)
    b2_p = jnp.pad(b2, (0, H_pad - H)).astype(jnp.float32).reshape(1, H_pad)

    meta = dict(F=F, H=H, H_pad=H_pad, use_resident=use_resident,
                compute_dtype=compute_dtype,
                resident_weight_bytes=resident_weight_bytes,
                vmem_cap=vmem_cap)
    return (w1_p, b1_p, w2_p, b2_p), meta


# ---------------------------------------------------------------------------
# Forward dispatcher
# ---------------------------------------------------------------------------

def linear_decoder(x, params, meta, *, block_b=512, out_dtype=None):
    """LinearDecoder forward: ReLU(x @ W1 + b1) @ W2 + b2.

    `out_dtype` may be set to jnp.bfloat16 to halve output HBM writeback
    when the consumer allows it; default matches x.dtype.
    """
    B, F = x.shape
    assert F == meta["F"], "x feature dim does not match prepared weights"
    H, H_pad = meta["H"], meta["H_pad"]
    if out_dtype is None:
        out_dtype = x.dtype
    w1_p, b1_p, w2_p, b2_p = params

    if meta["use_resident"]:
        x_itm = jnp.dtype(x.dtype).itemsize
        o_itm = jnp.dtype(out_dtype).itemsize
        vmem_cap = meta["vmem_cap"]
        w_bytes = meta["resident_weight_bytes"]

        # Batch tile: sweepable, multiple of 8 sublanes, no larger than batch.
        bb = max(8, (int(block_b) // 8) * 8)
        bb = min(bb, _round_up(B, 8))
        # Only split the batch for megacore (2 TCs); on single-TC v5e/v6e keep
        # the largest tile that fits (extra grid steps would only add overhead).
        if _num_tensorcores() >= 2 and _round_up(B, 8) // bb < 2 and bb >= 16:
            bb = _round_up(bb // 2, 8)

        def footprint(bb_):
            # single-buffered resident weights + double-buffered x/out tiles
            # + f32 intermediates live inside the kernel body.
            return (w_bytes
                    + 2 * bb_ * F * x_itm
                    + 2 * bb_ * H_pad * o_itm
                    + 2 * bb_ * H_pad * 4)

        while bb > 8 and footprint(bb) > vmem_cap:
            bb = max(8, _round_up(bb // 2, 8))

        B_pad = _round_up(B, bb)
        x_p = x if B_pad == B else jnp.pad(x, ((0, B_pad - B), (0, 0)))

        vmem_limit = int(min(vmem_cap,
                             max(32 << 20, int(1.3 * footprint(bb)))))
        out_padded = _fused_forward(x_p, w1_p, b1_p, w2_p, b2_p,
                                    bb=bb, out_dtype=out_dtype,
                                    vmem_limit=vmem_limit)
    else:
        # Weights too large to be VMEM-resident (e.g. wide decoders on v7x's
        # 64 MiB/TC): K/N-tiled matmuls with f32 accumulator scratch.
        F_pad = w1_p.shape[0]
        tm = min(256, _round_up(B, 16))      # 16-mult: bf16-friendly sublanes
        B_pad = _round_up(B, tm)
        tn = _pick_tile(H_pad)
        tk1 = _pick_tile(F_pad)
        tk2 = _pick_tile(H_pad)
        x_p = jnp.pad(x, ((0, B_pad - B), (0, F_pad - F)))

        itm = jnp.dtype(meta["compute_dtype"]).itemsize
        o_itm = jnp.dtype(out_dtype).itemsize
        tk_max = max(tk1, tk2)
        tile_foot = (2 * tm * tk_max * 4            # x / h input tiles (2-buf)
                     + 2 * tk_max * tn * itm        # weight tiles (2-buf)
                     + 2 * tm * tn * max(o_itm, 2)  # output tiles (2-buf)
                     + tm * tn * 4                  # accumulator
                     + 2 * tn * 4)                  # bias tile
        vmem_limit = int(min(meta["vmem_cap"],
                             max(32 << 20, int(1.5 * tile_foot))))
        out_padded = _tiled_forward(x_p, w1_p, b1_p, w2_p, b2_p,
                                    tm=tm, tn=tn, tk1=tk1, tk2=tk2,
                                    out_dtype=out_dtype,
                                    vmem_limit=vmem_limit)

    # Skip the slice (an extra HBM pass) when no padding was applied.
    if out_padded.shape == (B, H):
        return out_padded
    return out_padded[:B, :H]


# ---------------------------------------------------------------------------
# Demo / self-check
# ---------------------------------------------------------------------------

def _init_linear(key, fan_in, fan_out, dtype=jnp.float32):
    """nn.Linear-style U(-1/sqrt(fan_in), 1/sqrt(fan_in)); weight in (in, out)."""
    kw, kb = jax.random.split(key)
    bound = 1.0 / jnp.sqrt(jnp.asarray(fan_in, dtype))
    w = jax.random.uniform(kw, (fan_in, fan_out), dtype, -bound, bound)
    b = jax.random.uniform(kb, (fan_out,), dtype, -bound, bound)
    return w, b


if __name__ == "__main__":
    key = jax.random.PRNGKey(0)
    k_x, k_l1, k_l2 = jax.random.split(key, 3)

    batch = 8
    in_features = 32
    hidden = 32

    x = jax.random.normal(k_x, (batch, in_features), jnp.float32)
    w1, b1 = _init_linear(k_l1, in_features, hidden)
    w2, b2 = _init_linear(k_l2, hidden, hidden)

    # Prepare (pad + cast) the weights ONCE — hoisted out of the per-call path.
    params, meta = prepare_decoder_params(w1, b1, w2, b2)
    out = jax.block_until_ready(linear_decoder(x, params, meta))

    # Also exercise the K/N-tiled fallback path (used when the weights exceed
    # the per-core VMEM budget, e.g. wide decoders on v7x).
    params_t, meta_t = prepare_decoder_params(w1, b1, w2, b2, force_tiled=True)
    out_t = jax.block_until_ready(linear_decoder(x, params_t, meta_t))

    # Reference 1: same bf16-operand / f32-accumulate recipe as the kernels.
    xb = x.astype(jnp.bfloat16)
    w1b = w1.astype(jnp.bfloat16)
    w2b = w2.astype(jnp.bfloat16)
    h_ref = jnp.maximum(
        jnp.dot(xb, w1b, preferred_element_type=jnp.float32) + b1, 0.0)
    ref_bf16 = jnp.dot(h_ref.astype(jnp.bfloat16), w2b,
                       preferred_element_type=jnp.float32) + b2
    # Reference 2: full-f32 math of the original module (looser tolerance —
    # the kernel intentionally runs the matmuls in bf16).
    ref_f32 = jnp.maximum(x @ w1 + b1, 0.0) @ w2 + b2

    assert out.shape == (batch, hidden)
    assert out_t.shape == (batch, hidden)
    assert jnp.allclose(out, ref_bf16, atol=2e-3, rtol=2e-3), "fused vs bf16 ref"
    assert jnp.allclose(out, ref_f32, atol=5e-2, rtol=5e-2), "fused vs f32 ref"
    assert jnp.allclose(out_t, ref_bf16, atol=2e-3, rtol=2e-3), "tiled vs bf16 ref"
    assert jnp.allclose(out_t, ref_f32, atol=5e-2, rtol=5e-2), "tiled vs f32 ref"

    print("KERNEL_OK")
</pallas_src>

<mosaic_0001>
module attributes {stable_mosaic.version = 11 : i64} {
  func.func @_fused_mlp_kernel(%arg0: i32, %arg1: memref<8x32xf32, #tpu.memory_space<vmem>>, %arg2: memref<32x128xbf16, #tpu.memory_space<vmem>>, %arg3: memref<1x128xf32, #tpu.memory_space<vmem>>, %arg4: memref<128x128xbf16, #tpu.memory_space<vmem>>, %arg5: memref<1x128xf32, #tpu.memory_space<vmem>>, %arg6: memref<8x128xf32, #tpu.memory_space<vmem>>) attributes {dimension_semantics = [#tpu.dimension_semantics<parallel>], iteration_bounds = array<i64: 1>, scalar_prefetch = 0 : i64, scratch_operands = 0 : i64, tpu.core_type = #tpu.core_type<tc>, window_params = [{transform_indices = @transform_0, window_bounds = array<i64: 8, 32>}, {pipeline_mode = #tpu.pipeline_mode<synchronous>, transform_indices = @transform_1, window_bounds = array<i64: 32, 128>}, {pipeline_mode = #tpu.pipeline_mode<synchronous>, transform_indices = @transform_2, window_bounds = array<i64: 1, 128>}, {pipeline_mode = #tpu.pipeline_mode<synchronous>, transform_indices = @transform_3, window_bounds = array<i64: 128, 128>}, {pipeline_mode = #tpu.pipeline_mode<synchronous>, transform_indices = @transform_4, window_bounds = array<i64: 1, 128>}, {transform_indices = @transform_5, window_bounds = array<i64: 8, 128>}]} {
    %c0 = arith.constant 0 : index
    %c0_0 = arith.constant 0 : index
    %0 = vector.load %arg1[%c0, %c0_0] : memref<8x32xf32, #tpu.memory_space<vmem>>, vector<8x32xf32>
    %1 = arith.truncf %0 : vector<8x32xf32> to vector<8x32xbf16>
    %c0_1 = arith.constant 0 : index
    %c0_2 = arith.constant 0 : index
    %2 = vector.load %arg2[%c0_1, %c0_2] : memref<32x128xbf16, #tpu.memory_space<vmem>>, vector<32x128xbf16>
    %cst = arith.constant dense<0.000000e+00> : vector<8x128xf32>
    %3 = tpu.matmul %1, %2, %cst {dimension_numbers = #tpu.dot_dimension_numbers<[1], [0], [0], [1], [0, 0, 1, 1], [], []>} : vector<8x32xbf16>, vector<32x128xbf16>, vector<8x128xf32> -> vector<8x128xf32>
    %c0_3 = arith.constant 0 : index
    %c0_4 = arith.constant 0 : index
    %4 = vector.load %arg3[%c0_3, %c0_4] : memref<1x128xf32, #tpu.memory_space<vmem>>, vector<1x128xf32>
    %5 = vector.broadcast %4 : vector<1x128xf32> to vector<8x128xf32>
    %6 = arith.addf %3, %5 : vector<8x128xf32>
    %cst_5 = arith.constant 0.000000e+00 : f32
    %7 = vector.broadcast %cst_5 : f32 to vector<8x128xf32>
    %8 = arith.maximumf %6, %7 : vector<8x128xf32>
    %9 = arith.truncf %8 : vector<8x128xf32> to vector<8x128xbf16>
    %c0_6 = arith.constant 0 : index
    %c0_7 = arith.constant 0 : index
    %10 = vector.load %arg4[%c0_6, %c0_7] : memref<128x128xbf16, #tpu.memory_space<vmem>>, vector<128x128xbf16>
    %cst_8 = arith.constant dense<0.000000e+00> : vector<8x128xf32>
    %11 = tpu.matmul %9, %10, %cst_8 {dimension_numbers = #tpu.dot_dimension_numbers<[1], [0], [0], [1], [0, 0, 1, 1], [], []>} : vector<8x128xbf16>, vector<128x128xbf16>, vector<8x128xf32> -> vector<8x128xf32>
    %c0_9 = arith.constant 0 : index
    %c0_10 = arith.constant 0 : index
    %12 = vector.load %arg5[%c0_9, %c0_10] : memref<1x128xf32, #tpu.memory_space<vmem>>, vector<1x128xf32>
    %13 = vector.broadcast %12 : vector<1x128xf32> to vector<8x128xf32>
    %14 = arith.addf %11, %13 : vector<8x128xf32>
    %c0_11 = arith.constant 0 : index
    %c0_12 = arith.constant 0 : index
    %15 = vector.load %arg6[%c0_11, %c0_12] : memref<8x128xf32, #tpu.memory_space<vmem>>, vector<8x128xf32>
    tpu.vector_store %arg6[%c0_11, %c0_12], %14 {strides = array<i32>} : memref<8x128xf32, #tpu.memory_space<vmem>>, vector<8x128xf32>,
    return
  }
  func.func @transform_0(%arg0: i32) -> (i32, i32) {
    %c0_i32 = arith.constant 0 : i32
    %c0_i32_0 = arith.constant 0 : i32
    return %arg0, %c0_i32 : i32, i32
  }
  func.func @transform_1(%arg0: i32) -> (i32, i32) {
    %c0_i32 = arith.constant 0 : i32
    %c0_i32_0 = arith.constant 0 : i32
    %c0_i32_1 = arith.constant 0 : i32
    return %c0_i32, %c0_i32_0 : i32, i32
  }
  func.func @transform_2(%arg0: i32) -> (i32, i32) {
    %c0_i32 = arith.constant 0 : i32
    %c0_i32_0 = arith.constant 0 : i32
    %c0_i32_1 = arith.constant 0 : i32
    return %c0_i32, %c0_i32_0 : i32, i32
  }
  func.func @transform_3(%arg0: i32) -> (i32, i32) {
    %c0_i32 = arith.constant 0 : i32
    %c0_i32_0 = arith.constant 0 : i32
    %c0_i32_1 = arith.constant 0 : i32
    return %c0_i32, %c0_i32_0 : i32, i32
  }
  func.func @transform_4(%arg0: i32) -> (i32, i32) {
    %c0_i32 = arith.constant 0 : i32
    %c0_i32_0 = arith.constant 0 : i32
    %c0_i32_1 = arith.constant 0 : i32
    return %c0_i32, %c0_i32_0 : i32, i32
  }
  func.func @transform_5(%arg0: i32) -> (i32, i32) {
    %c0_i32 = arith.constant 0 : i32
    %c0_i32_0 = arith.constant 0 : i32
    return %arg0, %c0_i32 : i32, i32
  }
}

</mosaic_0001>

<bundles_post_ra>
// kernel: _fused_forward.1
= control target key start
LH: loop header
LB: loop body
LE: loop exit
PB: predicated region body
PF: predicated region fallthrough
CT: control target
= control target key end

     0   :  { %10 = vsyncpa [#allocation3], 0  ;;  %s523_s0 = inlined_call_operand.hbm [shape: f32[8,32], index: 0, kind: input, shape index: {}]   ;;  %s524_s1 = inlined_call_operand.hbm [shape: bf16[32,128], index: 1, kind: input, shape index: {}]   ;;  %s525_s2 = inlined_call_operand.vmem [shape: f32[1,128], index: 2, kind: input, shape index: {}]   ;;  %s526_s3 = inlined_call_operand.hbm [shape: bf16[128,128], index: 3, kind: input, shape index: {}]   ;;  %s527_s4 = inlined_call_operand.vmem [shape: f32[1,128], index: 4, kind: input, shape index: {}]   ;;  %s528_s5 = inlined_call_operand.hbm [shape: f32[8,128], index: 5, kind: output, shape index: {}]  }
   0x1   :  { %11 = vsyncpa [#allocation6], 0 }
   0x2   :  { %12 = vsyncpa [#allocation4], 0  ;;  %s425_s18 = smov [#allocation5]   ;;  %s331_s22 = scalar_lea.hbm %s524_s1, 256 }
   0x3   :  { %s28_s19 = sshll.u32 %s425_s18, 4  ;;  %p332_p0 = scmp.ne.s32.totalorder %s524_s1, %s331_s22  ;;  %s29_s19 = int_to_ptr.vmem [resolvable:$true] %s28_s19 }
   0x4   :  { %p335_p1 = scmp.lt.u32.totalorder %s331_s22, %s524_s1 }
   0x6   :  { %p337_p2 = pnand %p335_p1, %p332_p0 }
   0x8   :  { %340 = shalt.err (!%p337_p2)
}
   0x9   :  { %s341_s27 = scalar_lea.vmem %s29_s19, 256  ;;  %p346_p4 = scmp.lt.s32.totalorder %s29_s19, %s29_s19 }
   0xa   :  { %p342_p3 = scmp.ne.s32.totalorder %s29_s19, %s341_s27  ;;  %p347_p5 = scmp.lt.s32.totalorder %s341_s27, %s341_s27 }
   0xc   :  { %p348_p6 = por %p347_p5, %p346_p4 }
   0xe   :  { %p349_p7 = pnand %p348_p6, %p342_p3 }
  0x10   :  { %352 = shalt.err (!%p349_p7)
}
  0x11   :  { %s426_s28 = smov 64   ;;  %s427_s29 = smov 4  }
  0x12   :  { %34 = dma.hbm_to_vmem [thread:$0]  %s524_s1, 256, %s29_s19, [#allocation6], %s426_s28, %s426_s28, %s427_s29  }
  0x13   :  { %s428_s7 = smov [#allocation2]   ;;  %s429_s9 = smov [#allocation7]  }
  0x14   :  { %s19_s8 = sshll.u32 %s428_s7, 4  ;;  %s42_s10 = sshll.u32 %s429_s9, 4  ;;  %s20_s8 = int_to_ptr.vmem [resolvable:$true] %s19_s8  ;;  %s43_s10 = int_to_ptr.vmem [resolvable:$true] %s42_s10 }
  0x15   :  { %s353_s13 = scalar_lea.hbm %s523_s0, 128 }
  0x16   :  { %p354_p8 = scmp.ne.s32.totalorder %s523_s0, %s353_s13  ;;  %p357_p9 = scmp.lt.u32.totalorder %s353_s13, %s523_s0 }
  0x18   :  { %p359_p10 = pnand %p357_p9, %p354_p8 }
  0x1a   :  { %362 = shalt.err (!%p359_p10)
}
  0x1b   :  { %s363_s1 = scalar_lea.vmem %s20_s8, 128  ;;  %p368_p12 = scmp.lt.s32.totalorder %s20_s8, %s20_s8 }
  0x1c   :  { %p364_p11 = scmp.ne.s32.totalorder %s20_s8, %s363_s1  ;;  %p369_p13 = scmp.lt.s32.totalorder %s363_s1, %s363_s1 }
  0x1e   :  { %p370_p0 = por %p369_p13, %p368_p12 }
  0x20   :  { %p371_p1 = pnand %p370_p0, %p364_p11 }
  0x22   :  { %374 = shalt.err (!%p371_p1)
}
  0x23   :  { %22 = dma.hbm_to_vmem [thread:$0]  %s523_s0, 128, %s20_s8, [#allocation3]  }
  0x24   :  { %s375_s22 = scalar_lea.hbm %s526_s3, 1024 }
  0x25   :  { %p376_p2 = scmp.ne.s32.totalorder %s526_s3, %s375_s22  ;;  %p379_p3 = scmp.lt.u32.totalorder %s375_s22, %s526_s3 }
  0x27   :  { %p381_p4 = pnand %p379_p3, %p376_p2 }
  0x29   :  { %384 = shalt.err (!%p381_p4)
}
  0x2a   :  { %s385_s27 = scalar_lea.vmem %s43_s10, 1024  ;;  %p390_p6 = scmp.lt.s32.totalorder %s43_s10, %s43_s10 }
  0x2b   :  { %p386_p5 = scmp.ne.s32.totalorder %s43_s10, %s385_s27  ;;  %p391_p7 = scmp.lt.s32.totalorder %s385_s27, %s385_s27 }
  0x2d   :  { %p392_p8 = por %p391_p7, %p390_p6 }
  0x2f   :  { %p393_p9 = pnand %p392_p8, %p386_p5 }
  0x31   :  { %396 = shalt.err (!%p393_p9)
}
  0x32   :  { %48 = dma.hbm_to_vmem [thread:$0]  %s526_s3, 1024, %s43_s10, [#allocation6], %s426_s28, %s426_s28, %s427_s29  }
  0x33   :  { %419 = dma.done.wait [#allocation3], 128  }
  0x34   :  { %420 = vsyncadd [#allocation3], 4294967168 }
  0x35   :  { %421 = dma.done.wait [#allocation6], 1280  }
  0x36   :  { %422 = vsyncadd [#allocation6], 4294966016  ;;  %v430_v0 = vmov 0.0   ;;  %vm431_vm0 = vmmov 0   ;;  %v321_v1 = vld [vmem:[#allocation5] sm:$0xff]   ;;  %v322_v2 = vld [vmem:[#allocation5 + $0x8] sm:$0xff]  }
  0x37   :  { %285 = vmatprep.subr.bf16.mxu0 %v430_v0  ;;  %289 = vmatprep.mubr.msk.bf16.mxu0 %vm431_vm0, %v430_v0  ;;  %v61_v3 = vld [vmem:[#allocation2] sm:$0xff]  ;;  %v323_v4 = vld [vmem:[#allocation7] sm:$0xff]   ;;  %vm86_vm1 = vcmask 261120   ;;  %v325_v7 = vld [vmem:[#allocation7 + $0x10] sm:$0xff]   ;;  %s432_s7 = smov [#allocation8]  }
  0x38   :  { %293 = vmatprep.subr.bf16.mxu1 %v430_v0  ;;  %309 = vmatprep.mubr.msk.bf16.mxu1 %vm431_vm0, %v430_v0  ;;  %v62_v5 = vpack.c.bf16 %v61_v3, %v61_v3  ;;  %v324_v6 = vld [vmem:[#allocation7 + $0x8] sm:$0xff]   ;;  %v326_v8 = vld [vmem:[#allocation7 + $0x18] sm:$0xff]   ;;  %v327_v9 = vld [vmem:[#allocation7 + $0x20] sm:$0xff]   ;;  %s250_s8 = sshll.u32 %s432_s7, 4  ;;  %s251_s8 = int_to_ptr.vmem [resolvable:$true] %s250_s8 }
  0x39   :  { %286 = vmatpush3.bf16.msra.mxu0 %v321_v1  ;;  %294 = vmatpush3.bf16.msra.mxu1 %v323_v4  ;;  %v328_v10 = vld [vmem:[#allocation7 + $0x28] sm:$0xff]   ;;  %v329_v11 = vld [vmem:[#allocation7 + $0x30] sm:$0xff]   ;;  %v330_v12 = vld [vmem:[#allocation7 + $0x38] sm:$0xff]   ;;  %p402_p11 = scmp.lt.s32.totalorder %s251_s8, %s251_s8 }
  0x3a   :  { %287 = vmatprep.subr.bf16.mxu0 %v430_v0  ;;  %295 = vmatprep.subr.bf16.mxu1 %v430_v0  ;;  %v260_v13 = vld [vmem:[%s525_s2] ss:$0 sm:$0xff]  ;;  %s397_s2 = scalar_lea.vmem %s251_s8, 128 }
  0x3b   :  { %v264_v21 = vld [vmem:[%s527_s4] ss:$0 sm:$0xff]  ;;  %p398_p10 = scmp.ne.s32.totalorder %s251_s8, %s397_s2  ;;  %p403_p12 = scmp.lt.s32.totalorder %s397_s2, %s397_s2 }
  0x3d   :  { %288 = vmatpush3.bf16.msra.mxu0 %v322_v2  ;;  %296 = vmatpush3.bf16.msra.mxu1 %v324_v6  ;;  %p404_p13 = por %p403_p12, %p402_p11 }
  0x3e   :  { %297 = vmatprep.subr.bf16.mxu1 %v430_v0 }
  0x3f   :  { %p405_p0 = pnand %p404_p13, %p398_p10 }
  0x40   :  { %290 = vmatmul.mubr.msk.bf16.vlgmr.msra.gmra.mrb[0].mxu0 %vm86_vm1, %v62_v5 }
  0x41   :  { %298 = vmatpush3.bf16.msra.mxu1 %v325_v7 }
  0x42   :  { %299 = vmatprep.subr.bf16.mxu1 %v430_v0 }
  0x45   :  { %300 = vmatpush3.bf16.msra.mxu1 %v326_v8 }
  0x46   :  { %301 = vmatprep.subr.bf16.mxu1 %v430_v0 }
  0x49   :  { %302 = vmatpush3.bf16.msra.mxu1 %v327_v9 }
  0x4a   :  { %303 = vmatprep.subr.bf16.mxu1 %v430_v0 }
  0x4d   :  { %304 = vmatpush3.bf16.msra.mxu1 %v328_v10 }
  0x4e   :  { %305 = vmatprep.subr.bf16.mxu1 %v430_v0 }
  0x51   :  { %306 = vmatpush3.bf16.msra.mxu1 %v329_v11 }
  0x52   :  { %307 = vmatprep.subr.bf16.mxu1 %v430_v0 }
  0x55   :  { %308 = vmatpush3.bf16.msra.mxu1 %v330_v12 }
 0x113   :  { %v124_v14 = vpop.f32.mrb[0].mxu0 }
 0x114   :  { %v125_v15 = vadd.f32 %v260_v13, %v124_v14  ;;  %v291_v16 = vpop.f32.mrb[1].mxu0 }
 0x115   :  { %v127_v17 = vpop.f32.mrb[2].mxu0 }
 0x116   :  { %v130_v18 = vmax.f32 %v125_v15, 0.0  ;;  %v292_v19 = vpop.f32.mrb[3].mxu0 }
 0x118   :  { %v131_v20 = vpack.c.bf16 %v130_v18, %v130_v18 }
 0x11a   :  { %310 = vmatmul.mubr.bf16.vlgmr.msra.gmra.mrb[0].mxu1 %v131_v20 }
 0x1ed   :  { %v237_v22 = vpop.f32.mrb[0].mxu1 }
 0x1ee   :  { %v238_v23 = vadd.f32 %v264_v21, %v237_v22  ;;  %v311_v24 = vpop.f32.mrb[1].mxu1 }
 0x1ef   :  { %v240_v25 = vpop.f32.mrb[2].mxu1 }
 0x1f0   :  { %243 = vst [vmem:[#allocation8] sm:$0xff] %v238_v23  ;;  %v312_v26 = vpop.f32.mrb[3].mxu1 }
 0x1f1   :  { %408 = shalt.err (!%p405_p0)
}
 0x1f2   :  { %s409_s4 = scalar_lea.hbm %s528_s5, 128 }
 0x1f3   :  { %p410_p1 = scmp.ne.s32.totalorder %s528_s5, %s409_s4  ;;  %p413_p2 = scmp.lt.u32.totalorder %s409_s4, %s528_s5 }
 0x1f5   :  { %p415_p3 = pnand %p413_p2, %p410_p1 }
 0x1f7   :  { %418 = shalt.err (!%p415_p3)
}
 0x1f8   :  { %253 = dma.vmem_to_hbm [thread:$0]  %s251_s8, 128, %s528_s5, [#allocation4]  }
 0x1f9   :  { %423 = dma.done.wait [#allocation4], 128  }
 0x1fa   :  { %424 = vsyncadd [#allocation4], 4294967168 }
 0x1fb   :  { %257 = vsyncpa [#allocation3], 1 }
 0x1fc   :  { %258 = vsyncpa [#allocation6], 1 }
 0x1fd   :  { %259 = vsyncpa [#allocation4], 1 }

</bundles_post_ra>
